<compile_context>
chip_gen: v5e
topology: v5e:2x2
jax: 0.10.0
libtpu: 0.0.40
codegen_flags: <defaults>
</compile_context>

<pallas_src>
import jax
import jax.numpy as jnp
from jax.experimental import pallas as pl
from jax.experimental.pallas import tpu as pltpu

_LANES = 128


def _round_up(x, m):
    return ((x + m - 1) // m) * m


def mlp_kernel(x_ref, w1_ref, b1_ref, w2_ref, b2_ref, w3_ref, b3_ref, o_ref):
    # hidden layer 1: Linear + ReLU (MXU, f32 accumulate)
    h1 = jnp.dot(x_ref[...], w1_ref[...], preferred_element_type=jnp.float32)
    h1 = jnp.maximum(h1 + b1_ref[...], 0.0)
    # hidden layer 2: Linear + ReLU (MXU, f32 accumulate)
    h2 = jnp.dot(h1, w2_ref[...], preferred_element_type=jnp.float32)
    h2 = jnp.maximum(h2 + b2_ref[...], 0.0)
    # output layer (out_features == 1), computed transposed so the result is
    # lane-dense: (1, H2) contracted with (BM, H2) over H2 -> (1, BM).
    # This is the standard NT (q @ k^T) matmul pattern; batch lands on lanes.
    y = jax.lax.dot_general(
        w3_ref[...], h2,
        dimension_numbers=(((1,), (1,)), ((), ())),
        preferred_element_type=jnp.float32,
    )
    y = y + b3_ref[0, 0]                      # scalar bias from SMEM
    o_ref[...] = jax.nn.sigmoid(y).astype(o_ref.dtype)   # (1, BM) unmasked store


def _choose_bm(B, *, max_block_rows=4096, min_grid_steps=4):
    """Pick the batch tile BM.

    - Small B: one full-dim block (always legal, no padding, no masked-store
      concern worth optimizing).
    - Large B: BM is a multiple of 128 (lane-dense output blocks), capped at
      max_block_rows, and sized so the grid has >= min_grid_steps steps
      (>= 2 steps per TensorCore on v7x's megacore split)."""
    if B <= 2 * _LANES:
        return B
    bm = min(max_block_rows, pl.cdiv(B, min_grid_steps))
    return _round_up(bm, _LANES)


def mlp_forward(x, w1, b1, w2, b2, w3, b3, *, max_block_rows=4096):
    """x: (B, F); w1: (F, H1); b1: (1, H1); w2: (H1, H2); b2: (1, H2);
    w3: (H2, 1); b3: (1, 1). Returns (B, 1) float32."""
    B, F = x.shape
    H1 = w1.shape[1]
    H2 = w2.shape[1]

    w3_row = jnp.reshape(w3, (1, H2))   # (H2, 1) -> (1, H2) lane row
    b3_s = jnp.reshape(b3, (1, 1))      # scalar for SMEM

    BM = _choose_bm(B, max_block_rows=max_block_rows)
    grid = (pl.cdiv(B, BM),)            # ragged final block allowed: no jnp.pad

    invariant = lambda shape: pl.BlockSpec(shape, lambda i: (0,) * len(shape))

    flops = 2 * B * (F * H1 + H1 * H2 + H2)
    bytes_accessed = (
        x.size * x.dtype.itemsize
        + (w1.size + w2.size + w3.size + H1 + H2 + 1) * 4
        + B * 4
    )

    out = pl.pallas_call(
        mlp_kernel,
        out_shape=jax.ShapeDtypeStruct((1, B), jnp.float32),
        grid=grid,
        in_specs=[
            pl.BlockSpec((BM, F), lambda i: (i, 0)),   # x tile, pipelined
            invariant((F, H1)),                        # w1 (VMEM-resident)
            invariant((1, H1)),                        # b1
            invariant((H1, H2)),                       # w2
            invariant((1, H2)),                        # b2
            invariant((1, H2)),                        # w3 as a lane row
            pl.BlockSpec(memory_space=pltpu.MemorySpace.SMEM),  # b3 scalar
        ],
        out_specs=pl.BlockSpec((1, BM), lambda i: (0, i)),      # lane-dense slab
        compiler_params=pltpu.CompilerParams(
            dimension_semantics=("parallel",),   # megacore split on v7x
        ),
        cost_estimate=pl.CostEstimate(
            flops=flops, transcendentals=B, bytes_accessed=bytes_accessed),
    )(x, w1, b1, w2, b2, w3_row, b3_s)

    return out.reshape(B, 1)


def init_linear(key, fan_in, fan_out):
    """Deterministic PyTorch-style nn.Linear init: U(-1/sqrt(fan_in), +1/sqrt(fan_in))."""
    kw, kb = jax.random.split(key)
    bound = 1.0 / jnp.sqrt(jnp.float32(fan_in))
    # stored as (in, out) so the kernel does x @ W
    w = jax.random.uniform(kw, (fan_in, fan_out), jnp.float32, -bound, bound)
    b = jax.random.uniform(kb, (1, fan_out), jnp.float32, -bound, bound)
    return w, b


def reference_forward(x, w1, b1, w2, b2, w3, b3):
    h1 = jnp.maximum(x @ w1 + b1, 0.0)
    h2 = jnp.maximum(h1 @ w2 + b2, 0.0)
    return jax.nn.sigmoid(h2 @ w3 + b3)


if __name__ == "__main__":
    # Net(features_count=16, n_hl1=32, n_hl2=32)
    features_count, n_hl1, n_hl2 = 16, 32, 32

    key = jax.random.PRNGKey(0)
    kx, k1, k2, k3 = jax.random.split(key, 4)

    w1, b1 = init_linear(k1, features_count, n_hl1)
    w2, b2 = init_linear(k2, n_hl1, n_hl2)
    w3, b3 = init_linear(k3, n_hl2, 1)

    # Small batch (single full-dim block path) and a larger batch that
    # exercises the 4-step pipelined / megacore-shardable grid (BM=256).
    for batch in (8, 1024):
        x = jax.random.normal(kx, (batch, features_count), jnp.float32)
        y = mlp_forward(x, w1, b1, w2, b2, w3, b3)
        y = jax.block_until_ready(y)
        y_ref = reference_forward(x, w1, b1, w2, b2, w3, b3)
        assert y.shape == (batch, 1), y.shape
        assert jnp.allclose(y, y_ref, atol=1e-5, rtol=1e-5), (
            f"batch={batch}: max abs err {jnp.max(jnp.abs(y - y_ref))}"
        )

    print("KERNEL_OK")
</pallas_src>

<mosaic_0001>
module attributes {stable_mosaic.version = 11 : i64} {
  func.func @mlp_kernel(%arg0: i32, %arg1: memref<8x16xf32, #tpu.memory_space<vmem>>, %arg2: memref<16x32xf32, #tpu.memory_space<vmem>>, %arg3: memref<1x32xf32, #tpu.memory_space<vmem>>, %arg4: memref<32x32xf32, #tpu.memory_space<vmem>>, %arg5: memref<1x32xf32, #tpu.memory_space<vmem>>, %arg6: memref<1x32xf32, #tpu.memory_space<vmem>>, %arg7: memref<1x1xf32, #tpu.memory_space<smem>>, %arg8: memref<1x8xf32, #tpu.memory_space<vmem>>) attributes {dimension_semantics = [#tpu.dimension_semantics<parallel>], iteration_bounds = array<i64: 1>, scalar_prefetch = 0 : i64, scratch_operands = 0 : i64, tpu.core_type = #tpu.core_type<tc>, window_params = [{transform_indices = @transform_0, window_bounds = array<i64: 8, 16>}, {pipeline_mode = #tpu.pipeline_mode<synchronous>, transform_indices = @transform_1, window_bounds = array<i64: 16, 32>}, {pipeline_mode = #tpu.pipeline_mode<synchronous>, transform_indices = @transform_2, window_bounds = array<i64: 1, 32>}, {pipeline_mode = #tpu.pipeline_mode<synchronous>, transform_indices = @transform_3, window_bounds = array<i64: 32, 32>}, {pipeline_mode = #tpu.pipeline_mode<synchronous>, transform_indices = @transform_4, window_bounds = array<i64: 1, 32>}, {pipeline_mode = #tpu.pipeline_mode<synchronous>, transform_indices = @transform_5, window_bounds = array<i64: 1, 32>}, {transform_indices = @transform_6, window_bounds = array<i64: 1, 1>}, {transform_indices = @transform_7, window_bounds = array<i64: 1, 8>}]} {
    %c0 = arith.constant 0 : index
    %c0_0 = arith.constant 0 : index
    %0 = vector.load %arg1[%c0, %c0_0] : memref<8x16xf32, #tpu.memory_space<vmem>>, vector<8x16xf32>
    %c0_1 = arith.constant 0 : index
    %c0_2 = arith.constant 0 : index
    %1 = vector.load %arg2[%c0_1, %c0_2] : memref<16x32xf32, #tpu.memory_space<vmem>>, vector<16x32xf32>
    %cst = arith.constant dense<0.000000e+00> : vector<8x32xf32>
    %2 = tpu.matmul %0, %1, %cst {dimension_numbers = #tpu.dot_dimension_numbers<[1], [0], [0], [1], [0, 0, 1, 1], [], []>} : vector<8x16xf32>, vector<16x32xf32>, vector<8x32xf32> -> vector<8x32xf32>
    %c0_3 = arith.constant 0 : index
    %c0_4 = arith.constant 0 : index
    %3 = vector.load %arg3[%c0_3, %c0_4] : memref<1x32xf32, #tpu.memory_space<vmem>>, vector<1x32xf32>
    %4 = vector.broadcast %3 : vector<1x32xf32> to vector<8x32xf32>
    %5 = arith.addf %2, %4 : vector<8x32xf32>
    %cst_5 = arith.constant 0.000000e+00 : f32
    %6 = vector.broadcast %cst_5 : f32 to vector<8x32xf32>
    %7 = arith.maximumf %5, %6 : vector<8x32xf32>
    %c0_6 = arith.constant 0 : index
    %c0_7 = arith.constant 0 : index
    %8 = vector.load %arg4[%c0_6, %c0_7] : memref<32x32xf32, #tpu.memory_space<vmem>>, vector<32x32xf32>
    %cst_8 = arith.constant dense<0.000000e+00> : vector<8x32xf32>
    %9 = tpu.matmul %7, %8, %cst_8 {dimension_numbers = #tpu.dot_dimension_numbers<[1], [0], [0], [1], [0, 0, 1, 1], [], []>} : vector<8x32xf32>, vector<32x32xf32>, vector<8x32xf32> -> vector<8x32xf32>
    %c0_9 = arith.constant 0 : index
    %c0_10 = arith.constant 0 : index
    %10 = vector.load %arg5[%c0_9, %c0_10] : memref<1x32xf32, #tpu.memory_space<vmem>>, vector<1x32xf32>
    %11 = vector.broadcast %10 : vector<1x32xf32> to vector<8x32xf32>
    %12 = arith.addf %9, %11 : vector<8x32xf32>
    %cst_11 = arith.constant 0.000000e+00 : f32
    %13 = vector.broadcast %cst_11 : f32 to vector<8x32xf32>
    %14 = arith.maximumf %12, %13 : vector<8x32xf32>
    %c0_12 = arith.constant 0 : index
    %c0_13 = arith.constant 0 : index
    %15 = vector.load %arg6[%c0_12, %c0_13] : memref<1x32xf32, #tpu.memory_space<vmem>>, vector<1x32xf32>
    %cst_14 = arith.constant dense<0.000000e+00> : vector<1x8xf32>
    %16 = tpu.matmul %15, %14, %cst_14 {dimension_numbers = #tpu.dot_dimension_numbers<[1], [1], [0], [0], [0, 0, 1, 0], [], []>} : vector<1x32xf32>, vector<8x32xf32>, vector<1x8xf32> -> vector<1x8xf32>
    %c0_15 = arith.constant 0 : index
    %c0_16 = arith.constant 0 : index
    %17 = memref.load %arg7[%c0_15, %c0_16] : memref<1x1xf32, #tpu.memory_space<smem>>
    %18 = vector.broadcast %17 : f32 to vector<1x8xf32>
    %19 = arith.addf %16, %18 : vector<1x8xf32>
    %20 = arith.negf %19 : vector<1x8xf32>
    %21 = math.exp %20 : vector<1x8xf32>
    %cst_17 = arith.constant 1.000000e+00 : f32
    %22 = vector.broadcast %cst_17 : f32 to vector<1x8xf32>
    %23 = arith.addf %22, %21 : vector<1x8xf32>
    %24 = arith.divf %22, %23 : vector<1x8xf32>
    %c0_18 = arith.constant 0 : index
    %c0_19 = arith.constant 0 : index
    %25 = vector.load %arg8[%c0_18, %c0_19] : memref<1x8xf32, #tpu.memory_space<vmem>>, vector<1x8xf32>
    tpu.vector_store %arg8[%c0_18, %c0_19], %24 {strides = array<i32>} : memref<1x8xf32, #tpu.memory_space<vmem>>, vector<1x8xf32>,
    return
  }
  func.func @transform_0(%arg0: i32) -> (i32, i32) {
    %c0_i32 = arith.constant 0 : i32
    %c0_i32_0 = arith.constant 0 : i32
    return %arg0, %c0_i32 : i32, i32
  }
  func.func @transform_1(%arg0: i32) -> (i32, i32) {
    %c0_i32 = arith.constant 0 : i32
    %c0_i32_0 = arith.constant 0 : i32
    %c0_i32_1 = arith.constant 0 : i32
    return %c0_i32, %c0_i32_0 : i32, i32
  }
  func.func @transform_2(%arg0: i32) -> (i32, i32) {
    %c0_i32 = arith.constant 0 : i32
    %c0_i32_0 = arith.constant 0 : i32
    %c0_i32_1 = arith.constant 0 : i32
    return %c0_i32, %c0_i32_0 : i32, i32
  }
  func.func @transform_3(%arg0: i32) -> (i32, i32) {
    %c0_i32 = arith.constant 0 : i32
    %c0_i32_0 = arith.constant 0 : i32
    %c0_i32_1 = arith.constant 0 : i32
    return %c0_i32, %c0_i32_0 : i32, i32
  }
  func.func @transform_4(%arg0: i32) -> (i32, i32) {
    %c0_i32 = arith.constant 0 : i32
    %c0_i32_0 = arith.constant 0 : i32
    %c0_i32_1 = arith.constant 0 : i32
    return %c0_i32, %c0_i32_0 : i32, i32
  }
  func.func @transform_5(%arg0: i32) -> (i32, i32) {
    %c0_i32 = arith.constant 0 : i32
    %c0_i32_0 = arith.constant 0 : i32
    %c0_i32_1 = arith.constant 0 : i32
    return %c0_i32, %c0_i32_0 : i32, i32
  }
  func.func @transform_6(%arg0: i32) -> (i32, i32) {
    %c0_i32 = arith.constant 0 : i32
    %c0_i32_0 = arith.constant 0 : i32
    %c0_i32_1 = arith.constant 0 : i32
    return %c0_i32, %c0_i32_0 : i32, i32
  }
  func.func @transform_7(%arg0: i32) -> (i32, i32) {
    %c0_i32 = arith.constant 0 : i32
    %c0_i32_0 = arith.constant 0 : i32
    return %c0_i32, %arg0 : i32, i32
  }
}

</mosaic_0001>

<bundles_post_ra>
// kernel: tpu_custom_call.1
= control target key start
LH: loop header
LB: loop body
LE: loop exit
PB: predicated region body
PF: predicated region fallthrough
CT: control target
= control target key end

     0   :  { %13 = vsyncpa [#allocation4], 0  ;;  %s395_s0 = inlined_call_operand.hbm [shape: f32[8,16], index: 0, kind: input, shape index: {}]   ;;  %s396_s1 = inlined_call_operand.hbm [shape: f32[16,32], index: 1, kind: input, shape index: {}]   ;;  %s397_s2 = inlined_call_operand.vmem [shape: f32[1,32], index: 2, kind: input, shape index: {}]   ;;  %s398_s3 = inlined_call_operand.hbm [shape: f32[32,32], index: 3, kind: input, shape index: {}]   ;;  %s399_s4 = inlined_call_operand.vmem [shape: f32[1,32], index: 4, kind: input, shape index: {}]   ;;  %s400_s5 = inlined_call_operand.vmem [shape: f32[1,32], index: 5, kind: input, shape index: {}]   ;;  %s401_s6 = inlined_call_operand.<no memory space> [shape: f32[1,1], index: 6, kind: input, shape index: {}]   ;;  %s402_s7 = inlined_call_operand.hbm [shape: f32[1,8], index: 7, kind: output, shape index: {}]  }
   0x1   :  { %14 = vsyncpa [#allocation7], 0  ;;  %s31_s26 = sshll.u32 %s396_s1, 4  ;;  %s32_s26 = int_to_ptr.hbm [resolvable:$true] %s31_s26 }
   0x2   :  { %15 = vsyncpa [#allocation5], 0  ;;  %s325_s27 = smov [#allocation6]   ;;  %s21_s8 = sshll.u32 %s395_s0, 4  ;;  %s22_s8 = int_to_ptr.hbm [resolvable:$true] %s21_s8 }
   0x3   :  { %s33_s28 = sshll.u32 %s325_s27, 4  ;;  %s326_s9 = smov 128   ;;  %s34_s28 = int_to_ptr.vmem [resolvable:$true] %s33_s28 }
   0x4   :  { %s327_s10 = smov 8   ;;  %s328_s11 = smov [#allocation3]  }
   0x5   :  { %39 = dma.hbm_to_vmem [thread:$0]  %s32_s26, 256, %s34_s28, [#allocation7], %s326_s9, %s326_s9, %s327_s10  }
   0x6   :  { %s23_s12 = sshll.u32 %s328_s11, 4  ;;  %s46_s15 = sshll.u32 %s398_s3, 4  ;;  %s24_s12 = int_to_ptr.vmem [resolvable:$true] %s23_s12  ;;  %s47_s15 = int_to_ptr.hbm [resolvable:$true] %s46_s15 }
   0x7   :  { %26 = dma.hbm_to_vmem [thread:$0]  %s22_s8, 128, %s24_s12, [#allocation4]  }
   0x8   :  { %s329_s1 = smov [#allocation8]  }
   0x9   :  { %s48_s16 = sshll.u32 %s329_s1, 4  ;;  %s49_s16 = int_to_ptr.vmem [resolvable:$true] %s48_s16 }
   0xa   :  { %54 = dma.hbm_to_vmem [thread:$0]  %s47_s15, 512, %s49_s16, [#allocation7], %s326_s9, %s326_s9, %s327_s10  }
   0xb   :  { %319 = dma.done.wait [#allocation4], 128  }
   0xc   :  { %320 = vsyncadd [#allocation4], 4294967168 }
   0xd   :  { %321 = dma.done.wait [#allocation7], 768  }
   0xe   :  { %322 = vsyncadd [#allocation7], 4294966528  ;;  %v75_v0 = vld [vmem:[#allocation6 + $0x8] sm:$0xff]  ;;  %v74_v1 = vld [vmem:[#allocation6] sm:$0xff]  ;;  %vm80_vm0 = vcmask 130048   ;;  %vm113_vm1 = vcmask 261120   ;;  %v140_v16 = vstv %s401_s6 }
   0xf   :  { %98 = vmatpush.msra.mxu0 %v75_v0  ;;  %v73_v2 = vld [vmem:[#allocation3] sm:$0xff]  ;;  %v108_v3 = vld [vmem:[#allocation8 + $0x18] sm:$0xff]  ;;  %v107_v4 = vld [vmem:[#allocation8 + $0x10] sm:$0xff]  ;;  %s195_s6 = sshll.u32 %s402_s7, 4  ;;  %vm186_vm5 = vcmask 57344   ;;  %s196_s6 = int_to_ptr.hbm [resolvable:$true] %s195_s6 }
  0x10   :  { %129 = vmatpush.msra.mxu1 %v108_v3  ;;  %v106_v5 = vld [vmem:[#allocation8 + $0x8] sm:$0xff]  ;;  %v105_v6 = vld [vmem:[#allocation8] sm:$0xff] }
  0x11   :  { %99 = vmatpush.msra.mxu0 %v74_v1  ;;  %v217_v7 = vld [vmem:[%s397_s2] ss:$0 sm:$0xff] }
  0x12   :  { %206 = vmatmul.msk.f32.vlgmr.msra.gmra.mxu0 %vm80_vm0, %v73_v2  ;;  %130 = vmatpush.msra.mxu1 %v107_v4  ;;  %v218_v11 = vld [vmem:[%s399_s4] ss:$0 sm:$0xff]  ;;  %s330_s4 = smov [#allocation9]  }
  0x13   :  { %v138_v15 = vld [vmem:[%s400_s5] sm:$0x1]  ;;  %s193_s5 = sshll.u32 %s330_s4, 4  ;;  %s194_s5 = int_to_ptr.vmem [resolvable:$true] %s193_s5 }
  0x14   :  { %131 = vmatpush.msra.mxu1 %v106_v5 }
  0x16   :  { %132 = vmatpush.msra.mxu1 %v105_v6 }
  0x8f   :  { %v101_v8 = vpop.f32.mrf.mxu0 }
  0x90   :  { %v102_v9 = vadd.f32 %v217_v7, %v101_v8 }
  0x92   :  { %v104_v10 = vmax.f32 %v102_v9, 0.0 }
  0x94   :  { %207 = vmatmul.msk.f32.vlgmr.msra.gmra.mxu1 %vm113_vm1, %v104_v10 }
 0x111   :  { %v134_v12 = vpop.f32.mrf.mxu1 }
 0x112   :  { %v135_v13 = vadd.f32 %v218_v11, %v134_v12 }
 0x114   :  { %v137_v14 = vmax.f32 %v135_v13, 0.0 }
 0x116   :  { %208 = vmatpush.xpose.msk.msra.mxu2 %vm113_vm1, %v137_v14 }
 0x119   :  { %209 = vmatmul.msk.f32.vlgmr.msra.gmra.mxu2 %vm113_vm1, %v138_v15 }
 0x19c   :  { %v164_v17 = vpop.f32.mrf.mxu2 }
 0x19d   :  { %v165_v18 = vadd.f32 %v164_v17, %v140_v16 }
 0x19f   :  { %v210_v19 = vmul.f32 -1.442695, %v165_v18 }
 0x1a1   :  { %219 = vpow2.f32 %v210_v19 }
 0x1a7   :  { %v220_v20 = vpop.eup %219 }
 0x1a8   :  { %v170_v21 = vadd.f32 1.0, %v220_v20 }
 0x1aa   :  { %221 = vrcp.f32 %v170_v21  ;;  %v182_v25 = vand.u32 2147483648, %v170_v21  ;;  %v180_v27 = vand.u32 2147483647, %v170_v21  ;;  %vm176_vm3 = vweird.f32 %v170_v21 }
 0x1ac   :  { %v183_v29 = vor.u32 1.1754944e-38, %v182_v25  ;;  %vm181_vm6 = vcmp.eq.f32.partialorder %v180_v27, 8.507059e+37 }
 0x1b0   :  { %v222_v22 = vpop.eup %221 }
 0x1b1   :  { %v172_v23 = vmul.f32 %v222_v22, %v170_v21  ;;  %vm177_vm2 = vweird.f32 %v222_v22 }
 0x1b2   :  { %vm178_vm4 = vmor %vm176_vm3, %vm177_vm2 }
 0x1b3   :  { %v173_v24 = vsub.f32 1.0, %v172_v23 }
 0x1b5   :  { %v174_v26 = vmul.f32 %v222_v22, %v173_v24 }
 0x1b7   :  { %v175_v28 = vadd.f32 %v222_v22, %v174_v26 }
 0x1b9   :  { %v179_v30 = vsel %vm178_vm4, %v222_v22, %v175_v28 }
 0x1ba   :  { %v184_v31 = vsel %vm181_vm6, %v183_v29, %v179_v30 }
 0x1bb   :  { %187 = vst.msk [vmem:[#allocation9] sm:$0x1] %vm186_vm5, %v184_v31 }
 0x1bc   :  { %198 = dma.vmem_to_hbm [thread:$0]  %s194_s5, 16, %s196_s6, [#allocation5]  }
 0x1bd   :  { %323 = dma.done.wait [#allocation5], 16  }
 0x1be   :  { %324 = vsyncadd [#allocation5], 4294967280 }
 0x1bf   :  { %203 = vsyncpa [#allocation4], 1 }
 0x1c0   :  { %204 = vsyncpa [#allocation7], 1 }
 0x1c1   :  { %205 = vsyncpa [#allocation5], 1 }

</bundles_post_ra>
